<compile_context>
chip_gen: v6e
topology: v6e:2x2x1
jax: 0.10.0
libtpu: 0.0.40
codegen_flags: <defaults>
</compile_context>

<pallas_src>
import functools

import jax
import jax.numpy as jnp
import numpy as np
from jax import lax
from jax.experimental import pallas as pl
from jax.experimental.pallas import tpu as pltpu

HIDDEN = 32          # hidden width of the synthetic conv subnets
CLAMP = 2.0

# 3x3 stride-1 conv tap offsets, tap index t = kh*3 + kw.
OFFS_3x3 = tuple((kh - 1, kw - 1) for kh in range(3) for kw in range(3))
# The stride-2 conv, folded onto the space-to-depth basis, becomes a 2x2-tap conv.
OFFS_2x2 = ((-1, -1), (-1, 0), (0, -1), (0, 0))
# The 8 non-center shifts that need a border-validity mask (covers both tap sets).
OFFS_NZ = tuple(o for o in OFFS_3x3 if o != (0, 0))
MASK_IDX = {o: i for i, o in enumerate(OFFS_NZ)}


# ---------------------------------------------------------------------------
# Fused Pallas kernel: samples_per_step batch elements per grid step, all in VMEM
# ---------------------------------------------------------------------------

def _coupling_kernel(d_ref, m_ref,
                     w_hi1, b_hi1, w_hi2, b_hi2,
                     w_lo1, b_lo1, w_lo2, b_lo2,
                     y_ref, j_ref, *, hw, c1, n_samp, clamp, tap_dtype):
    H, W = hw                      # low-res spatial = (H_in/2, W_in/2)
    N = H * W
    L = n_samp * N                 # lane extent: n_samp samples packed on the lane axis

    d = d_ref[0]                   # (4*C, L) f32 == down(x), lane = s*N + h*W + w
    d1, d2 = d[:c1], d[c1:]        # static sublane split (no wrapper-side slicing)
    masks = m_ref[...]             # (8, L) 0/1 border-validity masks, precomputed host-side

    def conv(act, w, b, offsets, relu):
        """SAME conv as a single im2col matmul on the MXU (bf16 operands, f32 acc).

        act: (Cin, L) f32.  Each shifted tap is an XLU lane-roll + 0/1 mask multiply
        (the mask also kills cross-sample contamination from the batch packing).
        w:   (Cout, len(offsets)*Cin) bf16 ref, tap-major / channel-minor.
        b:   (Cout, 1) f32 ref.
        """
        act_t = act.astype(tap_dtype)
        taps = []
        for dh, dw in offsets:
            if dh == 0 and dw == 0:
                taps.append(act_t)                      # center tap: no shift/mask
                continue
            shift = (-(dh * W + dw)) % L                # result[p] = act[p + dh*W + dw]
            rolled = pltpu.roll(act_t, shift, axis=1)   # XLU slot, no VMEM copies
            i = MASK_IDX[(dh, dw)]
            taps.append(rolled * masks[i:i + 1])
        slab = jnp.concatenate(taps, axis=0).astype(jnp.bfloat16)   # (K, L)
        out = jnp.dot(w[...], slab, preferred_element_type=jnp.float32) + b[...]
        return jnp.maximum(out, 0.0) if relu else out

    def affine(xp, a):
        """y = x*exp(clamp*tanh(0.2*s)) + t ;  returns per-lane log-det rows (1, L)."""
        ch = xp.shape[0]
        sj = clamp * jnp.tanh(0.2 * a[:ch])             # transcendentals stay f32 (EUP)
        return xp * jnp.exp(sj) + a[ch:], jnp.sum(sj, axis=0, keepdims=True)

    # s_hi(x1): the stride-2 first conv is evaluated on the space-to-depth basis (d1).
    h_hi = conv(d1, w_hi1, b_hi1, OFFS_2x2, relu=True)      # (HIDDEN, L)
    a1 = conv(h_hi, w_hi2, b_hi2, OFFS_3x3, relu=False)     # (8*l2, L)
    y2, j2r = affine(d2, a1)                                # affine(down(x2), s_hi(x1))

    # s_lo(y2)
    h_lo = conv(y2, w_lo1, b_lo1, OFFS_3x3, relu=True)      # (HIDDEN, L)
    a2 = conv(h_lo, w_lo2, b_lo2, OFFS_3x3, relu=False)     # (8*l1, L)
    y1, j1r = affine(d1, a2)                                # affine(down(x1), s_lo(y2))

    # Direct slice writes — no output concat copy.
    y_ref[0, :c1, :] = y1
    y_ref[0, c1:, :] = y2

    # Per-sample log-det: reduce each sample's N-lane segment, broadcast over 128 lanes.
    jr = j1r + j2r                                          # (1, L)
    for s in range(n_samp):                                 # static, small
        val = jnp.sum(jr[:, s * N:(s + 1) * N])
        j_ref[0, s:s + 1, :] = jnp.full((1, 128), val, jnp.float32)


# ---------------------------------------------------------------------------
# Wrapper-side layout plumbing (pure reshapes/transposes, no compute hoisting)
# ---------------------------------------------------------------------------

def _space_to_depth(x):
    """(B, C, H, W) -> (B, 4*C, H//2, W//2); channel order 4*c + 2*i + j.

    Exactly the module's down(): grouped stride-2 conv with the fixed one-hot 2x2 kernels.
    """
    B, C, H, W = x.shape
    x = x.reshape(B, C, H // 2, 2, W // 2, 2)
    x = jnp.transpose(x, (0, 1, 3, 5, 2, 4))
    return x.reshape(B, 4 * C, H // 2, W // 2)


def _reorg_3x3(w):
    """(Cout, Cin, 3, 3) f32 -> (Cout, 9*Cin) bf16, tap-major (kh, kw), channel-minor."""
    co, ci = w.shape[0], w.shape[1]
    return jnp.transpose(w, (0, 2, 3, 1)).reshape(co, 9 * ci).astype(jnp.bfloat16)


def _reorg_strided(w):
    """Fold a stride-2 / pad-1 3x3 conv onto the space-to-depth basis.

    (Cout, Cin, 3, 3) f32 -> (Cout, 4*(4*Cin)) bf16: a 2x2-tap conv (offsets OFFS_2x2)
    over the 4*Cin space-to-depth channels (channel order 4*c + 2*i + j).
    """
    co, ci = w.shape[0], w.shape[1]
    zero = jnp.zeros((co, ci), w.dtype)

    def k_idx(parity, d):      # which original kernel tap feeds (pixel parity, offset d)
        if parity == 0:
            return 1 if d == 0 else None
        return 0 if d == -1 else 2

    blocks = []
    for dh, dw in OFFS_2x2:
        cols = []
        for i in (0, 1):
            for j in (0, 1):
                kh, kw = k_idx(i, dh), k_idx(j, dw)
                cols.append(zero if kh is None or kw is None else w[:, :, kh, kw])
        blocks.append(jnp.stack(cols, axis=2).reshape(co, 4 * ci))   # idx = 4*c + 2*i + j
    return jnp.concatenate(blocks, axis=1).astype(jnp.bfloat16)


def pack_params(params):
    """Reorganize conv weights into the fused kernel's matmul layout (bf16 for the MXU)."""
    return {
        "hi1_w": _reorg_strided(params["hi1_w"]), "hi1_b": params["hi1_b"].reshape(-1, 1),
        "hi2_w": _reorg_3x3(params["hi2_w"]), "hi2_b": params["hi2_b"].reshape(-1, 1),
        "lo1_w": _reorg_3x3(params["lo1_w"]), "lo1_b": params["lo1_b"].reshape(-1, 1),
        "lo2_w": _reorg_3x3(params["lo2_w"]), "lo2_b": params["lo2_b"].reshape(-1, 1),
    }


def _tap_dtype_for_backend():
    """bf16-early tap build on v6e/v7x (bf16 VPU); f32 on v5x / unknown chips."""
    try:
        kind = jax.devices()[0].device_kind.lower()
    except Exception:
        return jnp.float32
    if "v6" in kind or "v7" in kind or "7x" in kind:
        return jnp.bfloat16
    return jnp.float32


def _pick_samples_per_step(B, N):
    """Smallest divisor of B making the lane count a multiple of 128 (lane density first).

    On v7x with small B you may prefer samples_per_step=1 to keep >=2 grid points for
    the two TensorCores; that is exposed as an argument to coupling_forward.
    """
    for bs in range(1, B + 1):
        if B % bs == 0 and (bs * N) % 128 == 0:
            return bs
    return 1 if N >= 128 else B


def _make_masks(H, W, n_samp, dtype):
    """(8, n_samp*H*W) 0/1 border-validity masks for the shifted taps (host-side, static)."""
    n = np.arange(n_samp * H * W) % (H * W)
    hh, ww = n // W, n % W
    rows = [((hh + dh >= 0) & (hh + dh < H) & (ww + dw >= 0) & (ww + dw < W))
            for dh, dw in OFFS_NZ]
    return jnp.asarray(np.stack(rows, 0).astype(np.float32), dtype=dtype)


def coupling_forward(x, pk, clamp=CLAMP, samples_per_step=None):
    """DownsampleCouplingBlock forward (rev=False). Returns (cat(y1, y2), log_jacobian)."""
    B, C, H, W = x.shape
    l1 = C // 2
    Ho, Wo = H // 2, W // 2
    N = Ho * Wo

    bs = samples_per_step if samples_per_step is not None else _pick_samples_per_step(B, N)
    assert B % bs == 0, "samples_per_step must divide the batch size"
    G = B // bs
    L = bs * N
    tap_dtype = _tap_dtype_for_backend()

    # Layout plumbing only: space-to-depth, then pack bs samples onto the lane axis
    # (lane index within a grid step = s*N + h*W + w).
    d = _space_to_depth(x).reshape(G, bs, 4 * C, N)
    d = jnp.transpose(d, (0, 2, 1, 3)).reshape(G, 4 * C, L)

    masks = _make_masks(Ho, Wo, bs, tap_dtype)

    def whole(a):
        return pl.BlockSpec(a.shape, lambda g: (0,) * a.ndim)

    y_pk, j_pk = pl.pallas_call(
        functools.partial(_coupling_kernel, hw=(Ho, Wo), c1=4 * l1,
                          n_samp=bs, clamp=clamp, tap_dtype=tap_dtype),
        grid=(G,),
        in_specs=[
            pl.BlockSpec((1, 4 * C, L), lambda g: (g, 0, 0)),   # one packed activation input
            whole(masks),
            whole(pk["hi1_w"]), whole(pk["hi1_b"]),
            whole(pk["hi2_w"]), whole(pk["hi2_b"]),
            whole(pk["lo1_w"]), whole(pk["lo1_b"]),
            whole(pk["lo2_w"]), whole(pk["lo2_b"]),
        ],
        out_specs=(
            pl.BlockSpec((1, 4 * C, L), lambda g: (g, 0, 0)),
            pl.BlockSpec((1, bs, 128), lambda g: (g, 0, 0)),
        ),
        out_shape=(
            jax.ShapeDtypeStruct((G, 4 * C, L), jnp.float32),
            jax.ShapeDtypeStruct((G, bs, 128), jnp.float32),
        ),
        compiler_params=pltpu.CompilerParams(
            dimension_semantics=("parallel",)),        # v7x: grid steps over both TCs
    )(d, masks,
      pk["hi1_w"], pk["hi1_b"], pk["hi2_w"], pk["hi2_b"],
      pk["lo1_w"], pk["lo1_b"], pk["lo2_w"], pk["lo2_b"])

    # Unpack the lane-packed batch (layout plumbing only).
    y = y_pk.reshape(G, 4 * C, bs, N)
    y = jnp.transpose(y, (0, 2, 1, 3)).reshape(B, 4 * C, Ho, Wo)
    log_jac = j_pk[:, :, 0].reshape(B)
    return y, log_jac


# ---------------------------------------------------------------------------
# Parameter construction + pure-JAX float32 reference (correctness sanity check)
# ---------------------------------------------------------------------------

def make_params(key, l1, l2, hidden=HIDDEN):
    ks = jax.random.split(key, 8)

    def w(k, co, ci):
        return 0.1 * jax.random.normal(k, (co, ci, 3, 3), jnp.float32)

    def b(k, co):
        return 0.1 * jax.random.normal(k, (co,), jnp.float32)

    return {
        "hi1_w": w(ks[0], hidden, l1), "hi1_b": b(ks[1], hidden),         # s_hi conv1 (stride 2)
        "hi2_w": w(ks[2], 8 * l2, hidden), "hi2_b": b(ks[3], 8 * l2),     # s_hi conv2
        "lo1_w": w(ks[4], hidden, 4 * l2), "lo1_b": b(ks[5], hidden),     # s_lo conv1
        "lo2_w": w(ks[6], 8 * l1, hidden), "lo2_b": b(ks[7], 8 * l1),     # s_lo conv2
    }


def _conv_ref(x, w, b, stride, relu):
    y = lax.conv_general_dilated(
        x, w, (stride, stride), ((1, 1), (1, 1)),
        dimension_numbers=("NCHW", "OIHW", "NCHW"),
        precision=lax.Precision.HIGHEST) + b.reshape(1, -1, 1, 1)
    return jnp.maximum(y, 0.0) if relu else y


def _affine_ref(xp, a, clamp):
    ch = xp.shape[1]
    sj = clamp * jnp.tanh(0.2 * a[:, :ch])
    return xp * jnp.exp(sj) + a[:, ch:], jnp.sum(sj, axis=(1, 2, 3))


def coupling_forward_ref(x, params, clamp=CLAMP):
    """Mirrors DownsampleCouplingBlock.forward(rev=False) in float32."""
    C = x.shape[1]
    l1 = C // 2
    x1, x2 = x[:, :l1], x[:, l1:]
    y2 = _space_to_depth(x2)                                              # down(x2, 1)
    a1 = _conv_ref(_conv_ref(x1, params["hi1_w"], params["hi1_b"], 2, True),
                   params["hi2_w"], params["hi2_b"], 1, False)            # s_hi(x1)
    y2, j2 = _affine_ref(y2, a1, clamp)
    y1 = _space_to_depth(x1)                                              # down(x1, 0)
    a2 = _conv_ref(_conv_ref(y2, params["lo1_w"], params["lo1_b"], 1, True),
                   params["lo2_w"], params["lo2_b"], 1, False)            # s_lo(y2)
    y1, j1 = _affine_ref(y1, a2, clamp)
    return jnp.concatenate([y1, y2], axis=1), j1 + j2


# ---------------------------------------------------------------------------
# Main
# ---------------------------------------------------------------------------

if __name__ == "__main__":
    key = jax.random.PRNGKey(0)
    kx, kp = jax.random.split(key)

    B, C, H, W = 2, 4, 16, 16            # dims_in = [(4, 16, 16)]
    l1, l2 = C // 2, C - C // 2

    x = jax.random.normal(kx, (B, C, H, W), jnp.float32)
    params = make_params(kp, l1, l2)
    packed = pack_params(params)

    y, log_jac = jax.jit(coupling_forward)(x, packed)
    jax.block_until_ready((y, log_jac))

    # Sanity check vs. a float32 (HIGHEST precision) reference. The kernel feeds the MXU
    # bf16 operands (with f32 accumulation), hence the slightly loosened tolerances.
    y_ref, j_ref = coupling_forward_ref(x, params)
    assert y.shape == (B, 4 * C, H // 2, W // 2), "bad output shape"
    assert log_jac.shape == (B,), "bad log-jac shape"
    assert jnp.allclose(y, y_ref, rtol=5e-2, atol=5e-2), "output mismatch vs reference"
    assert jnp.allclose(log_jac, j_ref, rtol=5e-2, atol=3e-1), "log-jac mismatch vs reference"

    print("KERNEL_OK")
</pallas_src>

<mosaic_0001>
module attributes {stable_mosaic.version = 11 : i64} {
  func.func @_coupling_kernel(%arg0: i32, %arg1: memref<1x16x128xf32, #tpu.memory_space<vmem>>, %arg2: memref<8x128xf32, #tpu.memory_space<vmem>>, %arg3: memref<32x32xbf16, #tpu.memory_space<vmem>>, %arg4: memref<32x1xf32, #tpu.memory_space<vmem>>, %arg5: memref<16x288xbf16, #tpu.memory_space<vmem>>, %arg6: memref<16x1xf32, #tpu.memory_space<vmem>>, %arg7: memref<32x72xbf16, #tpu.memory_space<vmem>>, %arg8: memref<32x1xf32, #tpu.memory_space<vmem>>, %arg9: memref<16x288xbf16, #tpu.memory_space<vmem>>, %arg10: memref<16x1xf32, #tpu.memory_space<vmem>>, %arg11: memref<1x16x128xf32, #tpu.memory_space<vmem>>, %arg12: memref<1x2x128xf32, #tpu.memory_space<vmem>>) attributes {dimension_semantics = [#tpu.dimension_semantics<parallel>], iteration_bounds = array<i64: 1>, scalar_prefetch = 0 : i64, scratch_operands = 0 : i64, tpu.core_type = #tpu.core_type<tc>, window_params = [{transform_indices = @transform_0, window_bounds = array<i64: 1, 16, 128>}, {pipeline_mode = #tpu.pipeline_mode<synchronous>, transform_indices = @transform_1, window_bounds = array<i64: 8, 128>}, {pipeline_mode = #tpu.pipeline_mode<synchronous>, transform_indices = @transform_2, window_bounds = array<i64: 32, 32>}, {pipeline_mode = #tpu.pipeline_mode<synchronous>, transform_indices = @transform_3, window_bounds = array<i64: 32, 1>}, {pipeline_mode = #tpu.pipeline_mode<synchronous>, transform_indices = @transform_4, window_bounds = array<i64: 16, 288>}, {pipeline_mode = #tpu.pipeline_mode<synchronous>, transform_indices = @transform_5, window_bounds = array<i64: 16, 1>}, {pipeline_mode = #tpu.pipeline_mode<synchronous>, transform_indices = @transform_6, window_bounds = array<i64: 32, 72>}, {pipeline_mode = #tpu.pipeline_mode<synchronous>, transform_indices = @transform_7, window_bounds = array<i64: 32, 1>}, {pipeline_mode = #tpu.pipeline_mode<synchronous>, transform_indices = @transform_8, window_bounds = array<i64: 16, 288>}, {pipeline_mode = #tpu.pipeline_mode<synchronous>, transform_indices = @transform_9, window_bounds = array<i64: 16, 1>}, {transform_indices = @transform_10, window_bounds = array<i64: 1, 16, 128>}, {transform_indices = @transform_11, window_bounds = array<i64: 1, 2, 128>}]} {
    %c0 = arith.constant 0 : index
    %c0_0 = arith.constant 0 : index
    %c0_1 = arith.constant 0 : index
    %0 = vector.load %arg1[%c0, %c0_0, %c0_1] : memref<1x16x128xf32, #tpu.memory_space<vmem>>, vector<1x16x128xf32>
    %1 = vector.shape_cast %0 : vector<1x16x128xf32> to vector<16x128xf32>
    %2 = vector.extract_strided_slice %1 {offsets = [0, 0], sizes = [8, 128], strides = [1, 1]} : vector<16x128xf32> to vector<8x128xf32>
    %3 = vector.extract_strided_slice %1 {offsets = [8, 0], sizes = [8, 128], strides = [1, 1]} : vector<16x128xf32> to vector<8x128xf32>
    %c0_2 = arith.constant 0 : index
    %c0_3 = arith.constant 0 : index
    %4 = vector.load %arg2[%c0_2, %c0_3] : memref<8x128xf32, #tpu.memory_space<vmem>>, vector<8x128xf32>
    %c9_i32 = arith.constant 9 : i32
    %5 = tpu.dynamic_rotate %2 by %c9_i32 dim 1 : vector<8x128xf32>, i32 -> vector<8x128xf32>
    %6 = vector.extract_strided_slice %4 {offsets = [0, 0], sizes = [1, 128], strides = [1, 1]} : vector<8x128xf32> to vector<1x128xf32>
    %7 = vector.broadcast %6 : vector<1x128xf32> to vector<8x128xf32>
    %8 = arith.mulf %5, %7 : vector<8x128xf32>
    %c8_i32 = arith.constant 8 : i32
    %9 = tpu.dynamic_rotate %2 by %c8_i32 dim 1 : vector<8x128xf32>, i32 -> vector<8x128xf32>
    %10 = vector.extract_strided_slice %4 {offsets = [1, 0], sizes = [1, 128], strides = [1, 1]} : vector<8x128xf32> to vector<1x128xf32>
    %11 = vector.broadcast %10 : vector<1x128xf32> to vector<8x128xf32>
    %12 = arith.mulf %9, %11 : vector<8x128xf32>
    %c1_i32 = arith.constant 1 : i32
    %13 = tpu.dynamic_rotate %2 by %c1_i32 dim 1 : vector<8x128xf32>, i32 -> vector<8x128xf32>
    %14 = vector.extract_strided_slice %4 {offsets = [3, 0], sizes = [1, 128], strides = [1, 1]} : vector<8x128xf32> to vector<1x128xf32>
    %15 = vector.broadcast %14 : vector<1x128xf32> to vector<8x128xf32>
    %16 = arith.mulf %13, %15 : vector<8x128xf32>
    %17 = tpu.concatenate %8, %12, %16, %2 in 0 : vector<8x128xf32>, vector<8x128xf32>, vector<8x128xf32>, vector<8x128xf32> -> vector<32x128xf32>
    %18 = arith.truncf %17 : vector<32x128xf32> to vector<32x128xbf16>
    %c0_4 = arith.constant 0 : index
    %c0_5 = arith.constant 0 : index
    %19 = vector.load %arg3[%c0_4, %c0_5] : memref<32x32xbf16, #tpu.memory_space<vmem>>, vector<32x32xbf16>
    %cst = arith.constant dense<0.000000e+00> : vector<32x128xf32>
    %20 = tpu.matmul %19, %18, %cst {dimension_numbers = #tpu.dot_dimension_numbers<[1], [0], [0], [1], [0, 0, 1, 1], [], []>} : vector<32x32xbf16>, vector<32x128xbf16>, vector<32x128xf32> -> vector<32x128xf32>
    %c0_6 = arith.constant 0 : index
    %c0_7 = arith.constant 0 : index
    %21 = vector.load %arg4[%c0_6, %c0_7] : memref<32x1xf32, #tpu.memory_space<vmem>>, vector<32x1xf32>
    %22 = vector.broadcast %21 : vector<32x1xf32> to vector<32x128xf32>
    %23 = arith.addf %20, %22 : vector<32x128xf32>
    %cst_8 = arith.constant 0.000000e+00 : f32
    %24 = vector.broadcast %cst_8 : f32 to vector<32x128xf32>
    %25 = arith.maximumf %23, %24 : vector<32x128xf32>
    %c9_i32_9 = arith.constant 9 : i32
    %26 = tpu.dynamic_rotate %25 by %c9_i32_9 dim 1 : vector<32x128xf32>, i32 -> vector<32x128xf32>
    %27 = vector.extract_strided_slice %4 {offsets = [0, 0], sizes = [1, 128], strides = [1, 1]} : vector<8x128xf32> to vector<1x128xf32>
    %28 = vector.broadcast %27 : vector<1x128xf32> to vector<32x128xf32>
    %29 = arith.mulf %26, %28 : vector<32x128xf32>
    %c8_i32_10 = arith.constant 8 : i32
    %30 = tpu.dynamic_rotate %25 by %c8_i32_10 dim 1 : vector<32x128xf32>, i32 -> vector<32x128xf32>
    %31 = vector.extract_strided_slice %4 {offsets = [1, 0], sizes = [1, 128], strides = [1, 1]} : vector<8x128xf32> to vector<1x128xf32>
    %32 = vector.broadcast %31 : vector<1x128xf32> to vector<32x128xf32>
    %33 = arith.mulf %30, %32 : vector<32x128xf32>
    %c7_i32 = arith.constant 7 : i32
    %34 = tpu.dynamic_rotate %25 by %c7_i32 dim 1 : vector<32x128xf32>, i32 -> vector<32x128xf32>
    %35 = vector.extract_strided_slice %4 {offsets = [2, 0], sizes = [1, 128], strides = [1, 1]} : vector<8x128xf32> to vector<1x128xf32>
    %36 = vector.broadcast %35 : vector<1x128xf32> to vector<32x128xf32>
    %37 = arith.mulf %34, %36 : vector<32x128xf32>
    %c1_i32_11 = arith.constant 1 : i32
    %38 = tpu.dynamic_rotate %25 by %c1_i32_11 dim 1 : vector<32x128xf32>, i32 -> vector<32x128xf32>
    %39 = vector.extract_strided_slice %4 {offsets = [3, 0], sizes = [1, 128], strides = [1, 1]} : vector<8x128xf32> to vector<1x128xf32>
    %40 = vector.broadcast %39 : vector<1x128xf32> to vector<32x128xf32>
    %41 = arith.mulf %38, %40 : vector<32x128xf32>
    %c127_i32 = arith.constant 127 : i32
    %42 = tpu.dynamic_rotate %25 by %c127_i32 dim 1 : vector<32x128xf32>, i32 -> vector<32x128xf32>
    %43 = vector.extract_strided_slice %4 {offsets = [4, 0], sizes = [1, 128], strides = [1, 1]} : vector<8x128xf32> to vector<1x128xf32>
    %44 = vector.broadcast %43 : vector<1x128xf32> to vector<32x128xf32>
    %45 = arith.mulf %42, %44 : vector<32x128xf32>
    %c121_i32 = arith.constant 121 : i32
    %46 = tpu.dynamic_rotate %25 by %c121_i32 dim 1 : vector<32x128xf32>, i32 -> vector<32x128xf32>
    %47 = vector.extract_strided_slice %4 {offsets = [5, 0], sizes = [1, 128], strides = [1, 1]} : vector<8x128xf32> to vector<1x128xf32>
    %48 = vector.broadcast %47 : vector<1x128xf32> to vector<32x128xf32>
    %49 = arith.mulf %46, %48 : vector<32x128xf32>
    %c120_i32 = arith.constant 120 : i32
    %50 = tpu.dynamic_rotate %25 by %c120_i32 dim 1 : vector<32x128xf32>, i32 -> vector<32x128xf32>
    %51 = vector.extract_strided_slice %4 {offsets = [6, 0], sizes = [1, 128], strides = [1, 1]} : vector<8x128xf32> to vector<1x128xf32>
    %52 = vector.broadcast %51 : vector<1x128xf32> to vector<32x128xf32>
    %53 = arith.mulf %50, %52 : vector<32x128xf32>
    %c119_i32 = arith.constant 119 : i32
    %54 = tpu.dynamic_rotate %25 by %c119_i32 dim 1 : vector<32x128xf32>, i32 -> vector<32x128xf32>
    %55 = vector.extract_strided_slice %4 {offsets = [7, 0], sizes = [1, 128], strides = [1, 1]} : vector<8x128xf32> to vector<1x128xf32>
    %56 = vector.broadcast %55 : vector<1x128xf32> to vector<32x128xf32>
    %57 = arith.mulf %54, %56 : vector<32x128xf32>
    %58 = tpu.concatenate %29, %33, %37, %41, %25, %45, %49, %53, %57 in 0 : vector<32x128xf32>, vector<32x128xf32>, vector<32x128xf32>, vector<32x128xf32>, vector<32x128xf32>, vector<32x128xf32>, vector<32x128xf32>, vector<32x128xf32>, vector<32x128xf32> -> vector<288x128xf32>
    %59 = arith.truncf %58 : vector<288x128xf32> to vector<288x128xbf16>
    %c0_12 = arith.constant 0 : index
    %c0_13 = arith.constant 0 : index
    %60 = vector.load %arg5[%c0_12, %c0_13] : memref<16x288xbf16, #tpu.memory_space<vmem>>, vector<16x288xbf16>
    %cst_14 = arith.constant dense<0.000000e+00> : vector<16x128xf32>
    %61 = tpu.matmul %60, %59, %cst_14 {dimension_numbers = #tpu.dot_dimension_numbers<[1], [0], [0], [1], [0, 0, 1, 1], [], []>} : vector<16x288xbf16>, vector<288x128xbf16>, vector<16x128xf32> -> vector<16x128xf32>
    %c0_15 = arith.constant 0 : index
    %c0_16 = arith.constant 0 : index
    %62 = vector.load %arg6[%c0_15, %c0_16] : memref<16x1xf32, #tpu.memory_space<vmem>>, vector<16x1xf32>
    %63 = vector.broadcast %62 : vector<16x1xf32> to vector<16x128xf32>
    %64 = arith.addf %61, %63 : vector<16x128xf32>
    %65 = vector.extract_strided_slice %64 {offsets = [0, 0], sizes = [8, 128], strides = [1, 1]} : vector<16x128xf32> to vector<8x128xf32>
    %cst_17 = arith.constant 2.000000e-01 : f32
    %66 = vector.broadcast %cst_17 : f32 to vector<8x128xf32>
    %67 = arith.mulf %66, %65 : vector<8x128xf32>
    %68 = math.tanh %67 : vector<8x128xf32>
    %cst_18 = arith.constant 2.000000e+00 : f32
    %69 = vector.broadcast %cst_18 : f32 to vector<8x128xf32>
    %70 = arith.mulf %69, %68 : vector<8x128xf32>
    %71 = math.exp %70 : vector<8x128xf32>
    %72 = arith.mulf %3, %71 : vector<8x128xf32>
    %73 = vector.extract_strided_slice %64 {offsets = [8, 0], sizes = [8, 128], strides = [1, 1]} : vector<16x128xf32> to vector<8x128xf32>
    %74 = arith.addf %72, %73 : vector<8x128xf32>
    %cst_19 = arith.constant dense<0.000000e+00> : vector<128xf32>
    %75 = vector.multi_reduction <add>, %70, %cst_19 [0] : vector<8x128xf32> to vector<128xf32>
    %76 = vector.shape_cast %75 : vector<128xf32> to vector<1x128xf32>
    %c9_i32_20 = arith.constant 9 : i32
    %77 = tpu.dynamic_rotate %74 by %c9_i32_20 dim 1 : vector<8x128xf32>, i32 -> vector<8x128xf32>
    %78 = vector.extract_strided_slice %4 {offsets = [0, 0], sizes = [1, 128], strides = [1, 1]} : vector<8x128xf32> to vector<1x128xf32>
    %79 = vector.broadcast %78 : vector<1x128xf32> to vector<8x128xf32>
    %80 = arith.mulf %77, %79 : vector<8x128xf32>
    %c8_i32_21 = arith.constant 8 : i32
    %81 = tpu.dynamic_rotate %74 by %c8_i32_21 dim 1 : vector<8x128xf32>, i32 -> vector<8x128xf32>
    %82 = vector.extract_strided_slice %4 {offsets = [1, 0], sizes = [1, 128], strides = [1, 1]} : vector<8x128xf32> to vector<1x128xf32>
    %83 = vector.broadcast %82 : vector<1x128xf32> to vector<8x128xf32>
    %84 = arith.mulf %81, %83 : vector<8x128xf32>
    %c7_i32_22 = arith.constant 7 : i32
    %85 = tpu.dynamic_rotate %74 by %c7_i32_22 dim 1 : vector<8x128xf32>, i32 -> vector<8x128xf32>
    %86 = vector.extract_strided_slice %4 {offsets = [2, 0], sizes = [1, 128], strides = [1, 1]} : vector<8x128xf32> to vector<1x128xf32>
    %87 = vector.broadcast %86 : vector<1x128xf32> to vector<8x128xf32>
    %88 = arith.mulf %85, %87 : vector<8x128xf32>
    %c1_i32_23 = arith.constant 1 : i32
    %89 = tpu.dynamic_rotate %74 by %c1_i32_23 dim 1 : vector<8x128xf32>, i32 -> vector<8x128xf32>
    %90 = vector.extract_strided_slice %4 {offsets = [3, 0], sizes = [1, 128], strides = [1, 1]} : vector<8x128xf32> to vector<1x128xf32>
    %91 = vector.broadcast %90 : vector<1x128xf32> to vector<8x128xf32>
    %92 = arith.mulf %89, %91 : vector<8x128xf32>
    %c127_i32_24 = arith.constant 127 : i32
    %93 = tpu.dynamic_rotate %74 by %c127_i32_24 dim 1 : vector<8x128xf32>, i32 -> vector<8x128xf32>
    %94 = vector.extract_strided_slice %4 {offsets = [4, 0], sizes = [1, 128], strides = [1, 1]} : vector<8x128xf32> to vector<1x128xf32>
    %95 = vector.broadcast %94 : vector<1x128xf32> to vector<8x128xf32>
    %96 = arith.mulf %93, %95 : vector<8x128xf32>
    %c121_i32_25 = arith.constant 121 : i32
    %97 = tpu.dynamic_rotate %74 by %c121_i32_25 dim 1 : vector<8x128xf32>, i32 -> vector<8x128xf32>
    %98 = vector.extract_strided_slice %4 {offsets = [5, 0], sizes = [1, 128], strides = [1, 1]} : vector<8x128xf32> to vector<1x128xf32>
    %99 = vector.broadcast %98 : vector<1x128xf32> to vector<8x128xf32>
    %100 = arith.mulf %97, %99 : vector<8x128xf32>
    %c120_i32_26 = arith.constant 120 : i32
    %101 = tpu.dynamic_rotate %74 by %c120_i32_26 dim 1 : vector<8x128xf32>, i32 -> vector<8x128xf32>
    %102 = vector.extract_strided_slice %4 {offsets = [6, 0], sizes = [1, 128], strides = [1, 1]} : vector<8x128xf32> to vector<1x128xf32>
    %103 = vector.broadcast %102 : vector<1x128xf32> to vector<8x128xf32>
    %104 = arith.mulf %101, %103 : vector<8x128xf32>
    %c119_i32_27 = arith.constant 119 : i32
    %105 = tpu.dynamic_rotate %74 by %c119_i32_27 dim 1 : vector<8x128xf32>, i32 -> vector<8x128xf32>
    %106 = vector.extract_strided_slice %4 {offsets = [7, 0], sizes = [1, 128], strides = [1, 1]} : vector<8x128xf32> to vector<1x128xf32>
    %107 = vector.broadcast %106 : vector<1x128xf32> to vector<8x128xf32>
    %108 = arith.mulf %105, %107 : vector<8x128xf32>
    %109 = tpu.concatenate %80, %84, %88, %92, %74, %96, %100, %104, %108 in 0 : vector<8x128xf32>, vector<8x128xf32>, vector<8x128xf32>, vector<8x128xf32>, vector<8x128xf32>, vector<8x128xf32>, vector<8x128xf32>, vector<8x128xf32>, vector<8x128xf32> -> vector<72x128xf32>
    %110 = arith.truncf %109 : vector<72x128xf32> to vector<72x128xbf16>
    %c0_28 = arith.constant 0 : index
    %c0_29 = arith.constant 0 : index
    %111 = vector.load %arg7[%c0_28, %c0_29] : memref<32x72xbf16, #tpu.memory_space<vmem>>, vector<32x72xbf16>
    %cst_30 = arith.constant dense<0.000000e+00> : vector<32x128xf32>
    %112 = tpu.matmul %111, %110, %cst_30 {dimension_numbers = #tpu.dot_dimension_numbers<[1], [0], [0], [1], [0, 0, 1, 1], [], []>} : vector<32x72xbf16>, vector<72x128xbf16>, vector<32x128xf32> -> vector<32x128xf32>
    %c0_31 = arith.constant 0 : index
    %c0_32 = arith.constant 0 : index
    %113 = vector.load %arg8[%c0_31, %c0_32] : memref<32x1xf32, #tpu.memory_space<vmem>>, vector<32x1xf32>
    %114 = vector.broadcast %113 : vector<32x1xf32> to vector<32x128xf32>
    %115 = arith.addf %112, %114 : vector<32x128xf32>
    %cst_33 = arith.constant 0.000000e+00 : f32
    %116 = vector.broadcast %cst_33 : f32 to vector<32x128xf32>
    %117 = arith.maximumf %115, %116 : vector<32x128xf32>
    %c9_i32_34 = arith.constant 9 : i32
    %118 = tpu.dynamic_rotate %117 by %c9_i32_34 dim 1 : vector<32x128xf32>, i32 -> vector<32x128xf32>
    %119 = vector.extract_strided_slice %4 {offsets = [0, 0], sizes = [1, 128], strides = [1, 1]} : vector<8x128xf32> to vector<1x128xf32>
    %120 = vector.broadcast %119 : vector<1x128xf32> to vector<32x128xf32>
    %121 = arith.mulf %118, %120 : vector<32x128xf32>
    %c8_i32_35 = arith.constant 8 : i32
    %122 = tpu.dynamic_rotate %117 by %c8_i32_35 dim 1 : vector<32x128xf32>, i32 -> vector<32x128xf32>
    %123 = vector.extract_strided_slice %4 {offsets = [1, 0], sizes = [1, 128], strides = [1, 1]} : vector<8x128xf32> to vector<1x128xf32>
    %124 = vector.broadcast %123 : vector<1x128xf32> to vector<32x128xf32>
    %125 = arith.mulf %122, %124 : vector<32x128xf32>
    %c7_i32_36 = arith.constant 7 : i32
    %126 = tpu.dynamic_rotate %117 by %c7_i32_36 dim 1 : vector<32x128xf32>, i32 -> vector<32x128xf32>
    %127 = vector.extract_strided_slice %4 {offsets = [2, 0], sizes = [1, 128], strides = [1, 1]} : vector<8x128xf32> to vector<1x128xf32>
    %128 = vector.broadcast %127 : vector<1x128xf32> to vector<32x128xf32>
    %129 = arith.mulf %126, %128 : vector<32x128xf32>
    %c1_i32_37 = arith.constant 1 : i32
    %130 = tpu.dynamic_rotate %117 by %c1_i32_37 dim 1 : vector<32x128xf32>, i32 -> vector<32x128xf32>
    %131 = vector.extract_strided_slice %4 {offsets = [3, 0], sizes = [1, 128], strides = [1, 1]} : vector<8x128xf32> to vector<1x128xf32>
    %132 = vector.broadcast %131 : vector<1x128xf32> to vector<32x128xf32>
    %133 = arith.mulf %130, %132 : vector<32x128xf32>
    %c127_i32_38 = arith.constant 127 : i32
    %134 = tpu.dynamic_rotate %117 by %c127_i32_38 dim 1 : vector<32x128xf32>, i32 -> vector<32x128xf32>
    %135 = vector.extract_strided_slice %4 {offsets = [4, 0], sizes = [1, 128], strides = [1, 1]} : vector<8x128xf32> to vector<1x128xf32>
    %136 = vector.broadcast %135 : vector<1x128xf32> to vector<32x128xf32>
    %137 = arith.mulf %134, %136 : vector<32x128xf32>
    %c121_i32_39 = arith.constant 121 : i32
    %138 = tpu.dynamic_rotate %117 by %c121_i32_39 dim 1 : vector<32x128xf32>, i32 -> vector<32x128xf32>
    %139 = vector.extract_strided_slice %4 {offsets = [5, 0], sizes = [1, 128], strides = [1, 1]} : vector<8x128xf32> to vector<1x128xf32>
    %140 = vector.broadcast %139 : vector<1x128xf32> to vector<32x128xf32>
    %141 = arith.mulf %138, %140 : vector<32x128xf32>
    %c120_i32_40 = arith.constant 120 : i32
    %142 = tpu.dynamic_rotate %117 by %c120_i32_40 dim 1 : vector<32x128xf32>, i32 -> vector<32x128xf32>
    %143 = vector.extract_strided_slice %4 {offsets = [6, 0], sizes = [1, 128], strides = [1, 1]} : vector<8x128xf32> to vector<1x128xf32>
    %144 = vector.broadcast %143 : vector<1x128xf32> to vector<32x128xf32>
    %145 = arith.mulf %142, %144 : vector<32x128xf32>
    %c119_i32_41 = arith.constant 119 : i32
    %146 = tpu.dynamic_rotate %117 by %c119_i32_41 dim 1 : vector<32x128xf32>, i32 -> vector<32x128xf32>
    %147 = vector.extract_strided_slice %4 {offsets = [7, 0], sizes = [1, 128], strides = [1, 1]} : vector<8x128xf32> to vector<1x128xf32>
    %148 = vector.broadcast %147 : vector<1x128xf32> to vector<32x128xf32>
    %149 = arith.mulf %146, %148 : vector<32x128xf32>
    %150 = tpu.concatenate %121, %125, %129, %133, %117, %137, %141, %145, %149 in 0 : vector<32x128xf32>, vector<32x128xf32>, vector<32x128xf32>, vector<32x128xf32>, vector<32x128xf32>, vector<32x128xf32>, vector<32x128xf32>, vector<32x128xf32>, vector<32x128xf32> -> vector<288x128xf32>
    %151 = arith.truncf %150 : vector<288x128xf32> to vector<288x128xbf16>
    %c0_42 = arith.constant 0 : index
    %c0_43 = arith.constant 0 : index
    %152 = vector.load %arg9[%c0_42, %c0_43] : memref<16x288xbf16, #tpu.memory_space<vmem>>, vector<16x288xbf16>
    %cst_44 = arith.constant dense<0.000000e+00> : vector<16x128xf32>
    %153 = tpu.matmul %152, %151, %cst_44 {dimension_numbers = #tpu.dot_dimension_numbers<[1], [0], [0], [1], [0, 0, 1, 1], [], []>} : vector<16x288xbf16>, vector<288x128xbf16>, vector<16x128xf32> -> vector<16x128xf32>
    %c0_45 = arith.constant 0 : index
    %c0_46 = arith.constant 0 : index
    %154 = vector.load %arg10[%c0_45, %c0_46] : memref<16x1xf32, #tpu.memory_space<vmem>>, vector<16x1xf32>
    %155 = vector.broadcast %154 : vector<16x1xf32> to vector<16x128xf32>
    %156 = arith.addf %153, %155 : vector<16x128xf32>
    %157 = vector.extract_strided_slice %156 {offsets = [0, 0], sizes = [8, 128], strides = [1, 1]} : vector<16x128xf32> to vector<8x128xf32>
    %cst_47 = arith.constant 2.000000e-01 : f32
    %158 = vector.broadcast %cst_47 : f32 to vector<8x128xf32>
    %159 = arith.mulf %158, %157 : vector<8x128xf32>
    %160 = math.tanh %159 : vector<8x128xf32>
    %cst_48 = arith.constant 2.000000e+00 : f32
    %161 = vector.broadcast %cst_48 : f32 to vector<8x128xf32>
    %162 = arith.mulf %161, %160 : vector<8x128xf32>
    %163 = math.exp %162 : vector<8x128xf32>
    %164 = arith.mulf %2, %163 : vector<8x128xf32>
    %165 = vector.extract_strided_slice %156 {offsets = [8, 0], sizes = [8, 128], strides = [1, 1]} : vector<16x128xf32> to vector<8x128xf32>
    %166 = arith.addf %164, %165 : vector<8x128xf32>
    %cst_49 = arith.constant dense<0.000000e+00> : vector<128xf32>
    %167 = vector.multi_reduction <add>, %162, %cst_49 [0] : vector<8x128xf32> to vector<128xf32>
    %168 = vector.shape_cast %167 : vector<128xf32> to vector<1x128xf32>
    %c0_50 = arith.constant 0 : index
    %c0_51 = arith.constant 0 : index
    %c0_52 = arith.constant 0 : index
    %169 = vector.load %arg11[%c0_50, %c0_51, %c0_52] : memref<1x16x128xf32, #tpu.memory_space<vmem>>, vector<1x8x128xf32>
    %170 = vector.shape_cast %169 : vector<1x8x128xf32> to vector<8x128xf32>
    %171 = vector.shape_cast %166 : vector<8x128xf32> to vector<1x8x128xf32>
    tpu.vector_store %arg11[%c0_50, %c0_51, %c0_52], %171 {strides = array<i32>} : memref<1x16x128xf32, #tpu.memory_space<vmem>>, vector<1x8x128xf32>,
    %c0_53 = arith.constant 0 : index
    %c8 = arith.constant 8 : index
    %c0_54 = arith.constant 0 : index
    %172 = vector.load %arg11[%c0_53, %c8, %c0_54] : memref<1x16x128xf32, #tpu.memory_space<vmem>>, vector<1x8x128xf32>
    %173 = vector.shape_cast %172 : vector<1x8x128xf32> to vector<8x128xf32>
    %174 = vector.shape_cast %74 : vector<8x128xf32> to vector<1x8x128xf32>
    tpu.vector_store %arg11[%c0_53, %c8, %c0_54], %174 {strides = array<i32>} : memref<1x16x128xf32, #tpu.memory_space<vmem>>, vector<1x8x128xf32>,
    %175 = arith.addf %168, %76 : vector<1x128xf32>
    %176 = vector.extract_strided_slice %175 {offsets = [0, 0], sizes = [1, 64], strides = [1, 1]} : vector<1x128xf32> to vector<1x64xf32>
    %177 = vector.shape_cast %176 : vector<1x64xf32> to vector<1x1x64xf32>
    %cst_55 = arith.constant dense<0.000000e+00> : vector<1xf32>
    %178 = vector.multi_reduction <add>, %177, %cst_55 [1, 2] : vector<1x1x64xf32> to vector<1xf32>
    %179 = vector.shape_cast %178 : vector<1xf32> to vector<1x1x1xf32>
    %180 = vector.extract %179[0, 0, 0] : f32 from vector<1x1x1xf32>
    %181 = vector.broadcast %180 : f32 to vector<1x128xf32>
    %c0_56 = arith.constant 0 : index
    %c0_57 = arith.constant 0 : index
    %c0_58 = arith.constant 0 : index
    %182 = vector.load %arg12[%c0_56, %c0_57, %c0_58] : memref<1x2x128xf32, #tpu.memory_space<vmem>>, vector<1x1x128xf32>
    %183 = vector.shape_cast %182 : vector<1x1x128xf32> to vector<1x128xf32>
    %184 = vector.shape_cast %181 : vector<1x128xf32> to vector<1x1x128xf32>
    tpu.vector_store %arg12[%c0_56, %c0_57, %c0_58], %184 {strides = array<i32>} : memref<1x2x128xf32, #tpu.memory_space<vmem>>, vector<1x1x128xf32>,
    %185 = vector.extract_strided_slice %175 {offsets = [0, 64], sizes = [1, 64], strides = [1, 1]} : vector<1x128xf32> to vector<1x64xf32>
    %186 = vector.shape_cast %185 : vector<1x64xf32> to vector<1x1x64xf32>
    %cst_59 = arith.constant dense<0.000000e+00> : vector<1xf32>
    %187 = vector.multi_reduction <add>, %186, %cst_59 [1, 2] : vector<1x1x64xf32> to vector<1xf32>
    %188 = vector.shape_cast %187 : vector<1xf32> to vector<1x1x1xf32>
    %189 = vector.extract %188[0, 0, 0] : f32 from vector<1x1x1xf32>
    %190 = vector.broadcast %189 : f32 to vector<1x128xf32>
    %c0_60 = arith.constant 0 : index
    %c1 = arith.constant 1 : index
    %c0_61 = arith.constant 0 : index
    %191 = vector.load %arg12[%c0_60, %c1, %c0_61] : memref<1x2x128xf32, #tpu.memory_space<vmem>>, vector<1x1x128xf32>
    %192 = vector.shape_cast %191 : vector<1x1x128xf32> to vector<1x128xf32>
    %193 = vector.shape_cast %190 : vector<1x128xf32> to vector<1x1x128xf32>
    tpu.vector_store %arg12[%c0_60, %c1, %c0_61], %193 {strides = array<i32>} : memref<1x2x128xf32, #tpu.memory_space<vmem>>, vector<1x1x128xf32>,
    return
  }
  func.func @transform_0(%arg0: i32) -> (i32, i32, i32) {
    %c0_i32 = arith.constant 0 : i32
    %c0_i32_0 = arith.constant 0 : i32
    %c0_i32_1 = arith.constant 0 : i32
    return %arg0, %c0_i32, %c0_i32_0 : i32, i32, i32
  }
  func.func @transform_1(%arg0: i32) -> (i32, i32) {
    %c0_i32 = arith.constant 0 : i32
    %c0_i32_0 = arith.constant 0 : i32
    %c0_i32_1 = arith.constant 0 : i32
    return %c0_i32, %c0_i32_0 : i32, i32
  }
  func.func @transform_2(%arg0: i32) -> (i32, i32) {
    %c0_i32 = arith.constant 0 : i32
    %c0_i32_0 = arith.constant 0 : i32
    %c0_i32_1 = arith.constant 0 : i32
    return %c0_i32, %c0_i32_0 : i32, i32
  }
  func.func @transform_3(%arg0: i32) -> (i32, i32) {
    %c0_i32 = arith.constant 0 : i32
    %c0_i32_0 = arith.constant 0 : i32
    %c0_i32_1 = arith.constant 0 : i32
    return %c0_i32, %c0_i32_0 : i32, i32
  }
  func.func @transform_4(%arg0: i32) -> (i32, i32) {
    %c0_i32 = arith.constant 0 : i32
    %c0_i32_0 = arith.constant 0 : i32
    %c0_i32_1 = arith.constant 0 : i32
    return %c0_i32, %c0_i32_0 : i32, i32
  }
  func.func @transform_5(%arg0: i32) -> (i32, i32) {
    %c0_i32 = arith.constant 0 : i32
    %c0_i32_0 = arith.constant 0 : i32
    %c0_i32_1 = arith.constant 0 : i32
    return %c0_i32, %c0_i32_0 : i32, i32
  }
  func.func @transform_6(%arg0: i32) -> (i32, i32) {
    %c0_i32 = arith.constant 0 : i32
    %c0_i32_0 = arith.constant 0 : i32
    %c0_i32_1 = arith.constant 0 : i32
    return %c0_i32, %c0_i32_0 : i32, i32
  }
  func.func @transform_7(%arg0: i32) -> (i32, i32) {
    %c0_i32 = arith.constant 0 : i32
    %c0_i32_0 = arith.constant 0 : i32
    %c0_i32_1 = arith.constant 0 : i32
    return %c0_i32, %c0_i32_0 : i32, i32
  }
  func.func @transform_8(%arg0: i32) -> (i32, i32) {
    %c0_i32 = arith.constant 0 : i32
    %c0_i32_0 = arith.constant 0 : i32
    %c0_i32_1 = arith.constant 0 : i32
    return %c0_i32, %c0_i32_0 : i32, i32
  }
  func.func @transform_9(%arg0: i32) -> (i32, i32) {
    %c0_i32 = arith.constant 0 : i32
    %c0_i32_0 = arith.constant 0 : i32
    %c0_i32_1 = arith.constant 0 : i32
    return %c0_i32, %c0_i32_0 : i32, i32
  }
  func.func @transform_10(%arg0: i32) -> (i32, i32, i32) {
    %c0_i32 = arith.constant 0 : i32
    %c0_i32_0 = arith.constant 0 : i32
    %c0_i32_1 = arith.constant 0 : i32
    return %arg0, %c0_i32, %c0_i32_0 : i32, i32, i32
  }
  func.func @transform_11(%arg0: i32) -> (i32, i32, i32) {
    %c0_i32 = arith.constant 0 : i32
    %c0_i32_0 = arith.constant 0 : i32
    %c0_i32_1 = arith.constant 0 : i32
    return %arg0, %c0_i32, %c0_i32_0 : i32, i32, i32
  }
}

</mosaic_0001>

<bundles_post_ra>
// kernel: coupling_forward.1
= control target key start
LH: loop header
LB: loop body
LE: loop exit
PB: predicated region body
PF: predicated region fallthrough
CT: control target
= control target key end

     0   :  { %vm102_vm0 = vcmask 261120   ;;  %s994_s19 = smov 1   ;;  %s995_s20 = smov 8   ;;  %v996_v2 = vmov 0   ;;  %v43_v7 = vlaneseq  ;;  %v1002_v44 = vmov 0.0   ;;  %s1461_s0 = inlined_call_operand.vmem [shape: f32[1,16,128], index: 0, kind: input, shape index: {}]   ;;  %s1462_s2 = inlined_call_operand.vmem [shape: bf16[32,32], index: 2, kind: input, shape index: {}]   ;;  %s1463_s3 = inlined_call_operand.vmem [shape: f32[32,1], index: 3, kind: input, shape index: {}]   ;;  %s1464_s1 = inlined_call_operand.vmem [shape: f32[8,128], index: 1, kind: input, shape index: {}]   ;;  %s1465_s4 = inlined_call_operand.vmem [shape: bf16[16,288], index: 4, kind: input, shape index: {}]   ;;  %s1466_s5 = inlined_call_operand.vmem [shape: f32[16,1], index: 5, kind: input, shape index: {}]   ;;  %s1467_s10 = inlined_call_operand.vmem [shape: f32[1,16,128], index: 10, kind: output, shape index: {0}]   ;;  %s1468_s6 = inlined_call_operand.vmem [shape: bf16[32,72], index: 6, kind: input, shape index: {}]   ;;  %s1469_s7 = inlined_call_operand.vmem [shape: f32[32,1], index: 7, kind: input, shape index: {}]   ;;  %s1470_s8 = inlined_call_operand.vmem [shape: bf16[16,288], index: 8, kind: input, shape index: {}]   ;;  %s1471_s9 = inlined_call_operand.vmem [shape: f32[16,1], index: 9, kind: input, shape index: {}]   ;;  %s1472_s11 = inlined_call_operand.vmem [shape: f32[1,2,128], index: 11, kind: output, shape index: {1}]  }
   0x1   :  { %v38_v0 = vld [vmem:[%s1461_s0] sm:$0xff]  ;;  %971 = vset.pattern.permute.xlu1 %v996_v2  ;;  %972 = vset.pattern.permute.xlu0 %v996_v2  ;;  %v70_v3 = vld [vmem:[%s1463_s3 + $0x10] sm:$0xff]  ;;  %s997_s25 = smov 9   ;;  %v71_v5 = vld [vmem:[%s1463_s3 + $0x18] sm:$0xff]  ;;  %s998_s15 = smov 120   ;;  %vm1004_vm1 = vmmov 0  }
   0x2   :  { %55 = vrot.lane.b32.xlu0 %v38_v0, %s994_s19  ;;  %48 = vrot.lane.b32.xlu1 %v38_v0, %s995_s20  ;;  %v973_v1 = vld [vmem:[%s1462_s2] sm:$0xff]   ;;  %v69_v6 = vld [vmem:[%s1463_s3 + $0x8] sm:$0xff]  ;;  %v1088_v8 = vshrl.u32 %v43_v7, 7  ;;  %s1000_s16 = smov 7   ;;  %s1001_s17 = smov 127   ;;  %vm492_vm2 = vcmask 588800  }
   0x3   :  { %920 = vmatprep.mubr.msk.bf16.mxu0 %vm102_vm0, %v973_v1  ;;  %v68_v4 = vld [vmem:[%s1463_s3] sm:$0xff]  ;;  %v974_v24 = vld [vmem:[%s1462_s2 + $0x8] sm:$0xff]   ;;  %s999_s2 = smov 121   ;;  %s1003_s22 = smov 119   ;;  %vm499_vm3 = vcmask 1043456   ;;  %vm802_vm4 = vcmask 516096  }
   0x4   :  { %v59_v9 = vsub.s32 3, %v1088_v8  ;;  %v1094_v10 = vld [vmem:[%s1464_s1] sm:$0xff]  ;;  %v52_v11 = vsub.s32 1, %v1088_v8  ;;  %v45_v13 = vsub.s32 0, %v1088_v8  ;;  %v301_v46 = vld [vmem:[%s1466_s5 + $0x8] sm:$0xff]  ;;  %v256_v47 = vsub.s32 6, %v1088_v8 }
   0x5   :  { %v977_v43 = vld [vmem:[%s1465_s4 + $0x4] ss:$12 sps:$4 sm:$0xff]   ;;  %v196_v7 = vsub.s32 2, %v1088_v8 }
   0x6   :  { %41 = vrot.lane.b32.xlu0 %v38_v0, %s997_s25  ;;  %84 = vperm.xlu1 %971, %v70_v3   ;;  %v1098_v12 = vrot.slane %v1094_v10, %v59_v9  ;;  %v1102_v14 = vrot.slane %v1094_v10, %v52_v11  ;;  %v1106_v18 = vrot.slane %v1094_v10, %v45_v13  ;;  %v300_v45 = vld [vmem:[%s1466_s5] sm:$0xff] }
   0x7   :  { %362 = vmatprep.mubr.bf16.mxu1 %v977_v43  ;;  %v1204_v49 = vrot.slane %v1094_v10, %v256_v47 }
   0xa   :  { %74 = vperm.xlu1 %971, %v68_v4   ;;  %89 = vperm.xlu0 %972, %v71_v5   ;;  %v240_v4 = vsub.s32 5, %v1088_v8 }
   0xc   :  { %v1215_v13 = vrot.slane %v1094_v10, %v240_v4 }
   0xe   :  { %79 = vperm.xlu1 %971, %v69_v6  }
  0x74   :  { %v56_v15 = vpop.permute.xlu0 %55  ;;  %v49_v16 = vpop.permute.xlu1 %48 }
  0x75   :  { %v61_v17 = vmul.f32 %v1098_v12, %v56_v15  ;;  %v54_v19 = vmul.f32 %v1102_v14, %v49_v16 }
  0x77   :  { %v63_v20 = vpack.c.bf16 %v38_v0, %v61_v17 }
  0x78   :  { %v42_v21 = vpop.permute.xlu0 %41 }
  0x79   :  { %v47_v22 = vmul.f32 %v1106_v18, %v42_v21  ;;  %916 = vmatprep.subr.bf16.mxu0 %v63_v20 }
  0x7a   :  { %917 = vmatpush3.bf16.msra.mxu0 %v63_v20  ;;  %v1219_v20 = vrot.slane %v1094_v10, %v196_v7 }
  0x7b   :  { %v62_v23 = vpack.c.bf16 %v54_v19, %v47_v22 }
  0x7d   :  { %918 = vmatprep.subr.bf16.mxu0 %v62_v23 }
  0x7e   :  { %919 = vmatpush3.bf16.msra.mxu0 %v62_v23 }
  0x7f   :  { %924 = vmatprep.subr.bf16.mxu0 %v1002_v44 }
  0x81   :  { %921 = vmatmul.mubr.msk.bf16.vlgmr.msra.gmra.mxu0 %vm102_vm0, %v974_v24  ;;  %v85_v25 = vpop.permute.xlu1 %84  ;;  %v224_v24 = vsub.s32 4, %v1088_v8 }
  0x82   :  { %928 = vmatprep.mubr.msk.bf16.mxu0 %vm1004_vm1, %v1002_v44 }
  0x85   :  { %v75_v26 = vpop.permute.xlu1 %74  ;;  %v90_v30 = vpop.permute.xlu0 %89 }
  0x89   :  { %v80_v35 = vpop.permute.xlu1 %79 }
 0x141   :  { %v922_v27 = vpop.f32.mrf.mxu0 }
 0x142   :  { %v152_v28 = vadd.f32 %v922_v27, %v85_v25 }
 0x143   :  { %v143_v29 = vpop.f32.mrf.mxu0 }
 0x144   :  { %v1114_v31 = vmax.f32 %v152_v28, 0.0  ;;  %v144_v33 = vadd.f32 %v143_v29, %v75_v26 }
 0x145   :  { %v923_v32 = vpop.f32.mrf.mxu0 }
 0x146   :  { %v155_v34 = vadd.f32 %v923_v32, %v90_v30  ;;  %250 = vrot.lane.b32.xlu0 %v1114_v31, %s998_s15  ;;  %v1120_v39 = vmax.f32 %v144_v33, 0.0 }
 0x147   :  { %v146_v36 = vpop.f32.mrf.mxu0 }
 0x148   :  { %v1118_v37 = vmax.f32 %v155_v34, 0.0  ;;  %v147_v38 = vadd.f32 %v146_v36, %v80_v35  ;;  %v1230_v34 = vrot.slane %v1094_v10, %v224_v24 }
 0x14a   :  { %v1122_v40 = vmax.f32 %v147_v38, 0.0  ;;  %206 = vrot.lane.b32.xlu0 %v1114_v31, %s994_s19  ;;  %252 = vrot.lane.b32.xlu1 %v1118_v37, %s998_s15  ;;  %v287_v41 = vpack.c.bf16 %v1118_v37, %v1114_v31 }
 0x14c   :  { %v286_v42 = vpack.c.bf16 %v1122_v40, %v1120_v39 }
 0x14e   :  { %234 = vrot.lane.b32.xlu0 %v1114_v31, %s999_s2  ;;  %208 = vrot.lane.b32.xlu1 %v1118_v37, %s994_s19 }
 0x152   :  { %190 = vrot.lane.b32.xlu0 %v1114_v31, %s1000_s16  ;;  %236 = vrot.lane.b32.xlu1 %v1118_v37, %s999_s2 }
 0x156   :  { %218 = vrot.lane.b32.xlu0 %v1114_v31, %s1001_s17  ;;  %192 = vrot.lane.b32.xlu1 %v1118_v37, %s1000_s16 }
 0x15a   :  { %178 = vrot.lane.b32.xlu0 %v1114_v31, %s995_s20  ;;  %220 = vrot.lane.b32.xlu1 %v1118_v37, %s1001_s17 }
 0x15e   :  { %246 = vrot.lane.b32.xlu0 %v1120_v39, %s998_s15  ;;  %180 = vrot.lane.b32.xlu1 %v1118_v37, %s995_s20 }
 0x162   :  { %202 = vrot.lane.b32.xlu0 %v1120_v39, %s994_s19  ;;  %248 = vrot.lane.b32.xlu1 %v1122_v40, %s998_s15 }
 0x166   :  { %230 = vrot.lane.b32.xlu0 %v1120_v39, %s999_s2  ;;  %204 = vrot.lane.b32.xlu1 %v1122_v40, %s994_s19 }
 0x16a   :  { %186 = vrot.lane.b32.xlu0 %v1120_v39, %s1000_s16  ;;  %232 = vrot.lane.b32.xlu1 %v1122_v40, %s999_s2 }
 0x16e   :  { %214 = vrot.lane.b32.xlu0 %v1120_v39, %s1001_s17  ;;  %188 = vrot.lane.b32.xlu1 %v1122_v40, %s1000_s16 }
 0x172   :  { %174 = vrot.lane.b32.xlu0 %v1120_v39, %s995_s20  ;;  %216 = vrot.lane.b32.xlu1 %v1122_v40, %s1001_s17 }
 0x176   :  { %166 = vrot.lane.b32.xlu0 %v1114_v31, %s997_s25  ;;  %176 = vrot.lane.b32.xlu1 %v1122_v40, %s995_s20 }
 0x17a   :  { %162 = vrot.lane.b32.xlu0 %v1120_v39, %s997_s25  ;;  %168 = vrot.lane.b32.xlu1 %v1118_v37, %s997_s25 }
 0x17e   :  { %266 = vrot.lane.b32.xlu0 %v1114_v31, %s1003_s22  ;;  %164 = vrot.lane.b32.xlu1 %v1122_v40, %s997_s25  ;;  %v975_v31 = vld [vmem:[%s1465_s4] ss:$12 sps:$4 sm:$0xff]  }
 0x182   :  { %262 = vrot.lane.b32.xlu0 %v1120_v39, %s1003_s22  ;;  %268 = vrot.lane.b32.xlu1 %v1118_v37, %s1003_s22 }
 0x186   :  { %304 = vperm.xlu0 %972, %v300_v45   ;;  %264 = vrot.lane.b32.xlu1 %v1122_v40, %s1003_s22 }
 0x18a   :  { %309 = vperm.xlu1 %971, %v301_v46  }
 0x1b8   :  { %v251_v48 = vpop.permute.xlu0 %250 }
 0x1b9   :  { %v260_v52 = vmul.f32 %v1204_v49, %v251_v48 }
 0x1bc   :  { %v253_v50 = vpop.permute.xlu1 %252  ;;  %v207_v51 = vpop.permute.xlu0 %206 }
 0x1bd   :  { %v261_v53 = vmul.f32 %v1204_v49, %v253_v50  ;;  %v212_v57 = vmul.f32 %v207_v51, %v1098_v12 }
 0x1bf   :  { %v293_v54 = vpack.c.bf16 %v261_v53, %v260_v52 }
 0x1c0   :  { %v209_v55 = vpop.permute.xlu1 %208  ;;  %v235_v56 = vpop.permute.xlu0 %234 }
 0x1c1   :  { %v213_v58 = vmul.f32 %v209_v55, %v1098_v12  ;;  %859 = vmatprep.subr.bf16.mxu1 %v293_v54  ;;  %v244_v23 = vmul.f32 %v1215_v13, %v235_v56 }
 0x1c3   :  { %v285_v59 = vpack.c.bf16 %v213_v58, %v212_v57 }
 0x1c4   :  { %v237_v60 = vpop.permute.xlu1 %236  ;;  %v191_v61 = vpop.permute.xlu0 %190 }
 0x1c5   :  { %860 = vmatpush3.bf16.msra.mxu1 %v285_v59  ;;  %v245_v16 = vmul.f32 %v1215_v13, %v237_v60  ;;  %v200_v30 = vmul.f32 %v1219_v20, %v191_v61 }
 0x1c7   :  { %v291_v27 = vpack.c.bf16 %v245_v16, %v244_v23 }
 0x1c8   :  { %v193_v62 = vpop.permute.xlu1 %192  ;;  %v219_v63 = vpop.permute.xlu0 %218 }
 0x1c9   :  { %v201_v25 = vmul.f32 %v1219_v20, %v193_v62  ;;  %v228_v48 = vmul.f32 %v1230_v34, %v219_v63 }
 0x1cb   :  { %v283_v35 = vpack.c.bf16 %v201_v25, %v200_v30 }
 0x1cc   :  { %v221_v0 = vpop.permute.xlu1 %220  ;;  %v179_v1 = vpop.permute.xlu0 %178 }
 0x1cd   :  { %v229_v38 = vmul.f32 %v1230_v34, %v221_v0  ;;  %v184_v55 = vmul.f32 %v179_v1, %v1102_v14 }
 0x1cf   :  { %v289_v52 = vpack.c.bf16 %v229_v38, %v228_v48 }
 0x1d0   :  { %v181_v2 = vpop.permute.xlu1 %180  ;;  %v247_v3 = vpop.permute.xlu0 %246 }
 0x1d1   :  { %v258_v9 = vmul.f32 %v1204_v49, %v247_v3  ;;  %v185_v50 = vmul.f32 %v181_v2, %v1102_v14 }
 0x1d3   :  { %v281_v58 = vpack.c.bf16 %v185_v50, %v184_v55  ;;  %v39_v50 = vld [vmem:[%s1461_s0 + $0x8] sm:$0xff] }
 0x1d4   :  { %v249_v5 = vpop.permute.xlu1 %248  ;;  %v203_v6 = vpop.permute.xlu0 %202 }
 0x1d5   :  { %v259_v11 = vmul.f32 %v1204_v49, %v249_v5  ;;  %v210_v21 = vmul.f32 %v203_v6, %v1098_v12  ;;  %v272_v5 = vsub.s32 7, %v1088_v8 }
 0x1d7   :  { %v292_v15 = vpack.c.bf16 %v259_v11, %v258_v9  ;;  %v1251_v16 = vrot.slane %v1094_v10, %v272_v5 }
 0x1d8   :  { %v205_v17 = vpop.permute.xlu1 %204  ;;  %v231_v19 = vpop.permute.xlu0 %230 }
 0x1d9   :  { %v211_v22 = vmul.f32 %v205_v17, %v1098_v12  ;;  %861 = vmatprep.subr.bf16.mxu1 %v292_v15  ;;  %v242_v32 = vmul.f32 %v1215_v13, %v231_v19 }
 0x1db   :  { %v284_v26 = vpack.c.bf16 %v211_v22, %v210_v21 }
 0x1dc   :  { %v233_v28 = vpop.permute.xlu1 %232  ;;  %v187_v29 = vpop.permute.xlu0 %186 }
 0x1dd   :  { %v243_v33 = vmul.f32 %v1215_v13, %v233_v28  ;;  %862 = vmatpush3.bf16.msra.mxu1 %v284_v26  ;;  %v198_v46 = vmul.f32 %v1219_v20, %v187_v29 }
 0x1de   :  { %863 = vmatprep.subr.bf16.mxu1 %v291_v27 }
 0x1df   :  { %v290_v36 = vpack.c.bf16 %v243_v33, %v242_v32 }
 0x1e0   :  { %v189_v43 = vpop.permute.xlu1 %188  ;;  %v215_v45 = vpop.permute.xlu0 %214 }
 0x1e1   :  { %v199_v47 = vmul.f32 %v1219_v20, %v189_v43  ;;  %864 = vmatpush3.bf16.msra.mxu1 %v283_v35  ;;  %v226_v56 = vmul.f32 %v1230_v34, %v215_v45 }
 0x1e2   :  { %865 = vmatprep.subr.bf16.mxu1 %v290_v36 }
 0x1e3   :  { %v282_v51 = vpack.c.bf16 %v199_v47, %v198_v46 }
 0x1e4   :  { %v217_v53 = vpop.permute.xlu1 %216  ;;  %v175_v54 = vpop.permute.xlu0 %174 }
 0x1e5   :  { %v227_v57 = vmul.f32 %v1230_v34, %v217_v53  ;;  %866 = vmatpush3.bf16.msra.mxu1 %v282_v51  ;;  %v182_v62 = vmul.f32 %v175_v54, %v1102_v14 }
 0x1e6   :  { %867 = vmatprep.subr.bf16.mxu1 %v289_v52 }
 0x1e7   :  { %v288_v59 = vpack.c.bf16 %v227_v57, %v226_v56  ;;  %v979_v56 = vld [vmem:[%s1468_s6] sm:$0xff]   ;;  %v461_v57 = vld [vmem:[%s1469_s7 + $0x18] sm:$0xff] }
 0x1e8   :  { %v177_v60 = vpop.permute.xlu1 %176  ;;  %v167_v61 = vpop.permute.xlu0 %166 }
 0x1e9   :  { %v183_v63 = vmul.f32 %v177_v60, %v1102_v14  ;;  %868 = vmatpush3.bf16.msra.mxu1 %v281_v58  ;;  %v172_v1 = vmul.f32 %v167_v61, %v1106_v18  ;;  %v460_v58 = vld [vmem:[%s1469_s7 + $0x10] sm:$0xff]  ;;  %v458_v60 = vld [vmem:[%s1469_s7] sm:$0xff] }
 0x1ea   :  { %869 = vmatprep.subr.bf16.mxu1 %v288_v59  ;;  %v459_v59 = vld [vmem:[%s1469_s7 + $0x8] sm:$0xff] }
 0x1eb   :  { %v280_v0 = vpack.c.bf16 %v183_v63, %v182_v62 }
 0x1ec   :  { %v169_v2 = vpop.permute.xlu1 %168  ;;  %v163_v3 = vpop.permute.xlu0 %162 }
 0x1ed   :  { %v173_v4 = vmul.f32 %v169_v2, %v1106_v18  ;;  %870 = vmatpush3.bf16.msra.mxu1 %v280_v0  ;;  %v170_v11 = vmul.f32 %v163_v3, %v1106_v18 }
 0x1ee   :  { %871 = vmatprep.subr.bf16.mxu1 %v287_v41 }
 0x1ef   :  { %v279_v6 = vpack.c.bf16 %v173_v4, %v172_v1 }
 0x1f0   :  { %v165_v7 = vpop.permute.xlu1 %164  ;;  %v267_v9 = vpop.permute.xlu0 %266 }
 0x1f1   :  { %v171_v15 = vmul.f32 %v165_v7, %v1106_v18  ;;  %872 = vmatpush3.bf16.msra.mxu1 %v279_v6  ;;  %v276_v37 = vmul.f32 %v1251_v16, %v267_v9 }
 0x1f2   :  { %873 = vmatprep.subr.bf16.mxu1 %v286_v42  ;;  %v978_v42 = vld [vmem:[%s1465_s4 + $0x8] ss:$12 sps:$4 sm:$0xff]  }
 0x1f3   :  { %v278_v8 = vpack.c.bf16 %v171_v15, %v170_v11 }
 0x1f4   :  { %v269_v17 = vpop.permute.xlu1 %268  ;;  %v263_v19 = vpop.permute.xlu0 %262 }
 0x1f5   :  { %v277_v41 = vmul.f32 %v1251_v16, %v269_v17  ;;  %874 = vmatpush3.bf16.msra.mxu1 %v278_v8  ;;  %v274_v22 = vmul.f32 %v1251_v16, %v263_v19 }
 0x1f7   :  { %v295_v21 = vpack.c.bf16 %v277_v41, %v276_v37 }
 0x1f8   :  { %v265_v10 = vpop.permute.xlu1 %264  ;;  %363 = vmatmul.mubr.bf16.vlgmr.msra.gmra.mxu1 %v975_v31 }
 0x1f9   :  { %v275_v39 = vmul.f32 %v1251_v16, %v265_v10  ;;  %925 = vmatpush3.bf16.msra.mxu0 %v295_v21 }
 0x1fa   :  { %926 = vmatprep.subr.bf16.mxu0 %v1002_v44 }
 0x1fb   :  { %v294_v40 = vpack.c.bf16 %v275_v39, %v274_v22  ;;  %v980_v22 = vld [vmem:[%s1468_s6 + $0x8] sm:$0xff]  }
 0x1fd   :  { %927 = vmatpush3.bf16.msra.mxu0 %v294_v40 }
 0x200   :  { %929 = vmatmul.mubr.msk.bf16.vlgmr.msra.gmra.mxu0 %vm102_vm0, %v978_v42 }
 0x201   :  { %v305_v26 = vpop.permute.xlu0 %304  ;;  %942 = vmatprep.mubr.msk.bf16.mxu0 %vm492_vm2, %v979_v56 }
 0x205   :  { %v310_v48 = vpop.permute.xlu1 %309 }
 0x2b8   :  { %v875_v23 = vpop.f32.mrf.mxu1 }
 0x2ba   :  { %v876_v24 = vpop.f32.mrf.mxu1 }
 0x2bb   :  { %v877_v25 = vadd.f32 %v876_v24, %v875_v23 }
 0x2bc   :  { %v878_v45 = vpop.f32.mrf.mxu1 }
 0x2bd   :  { %v365_v27 = vadd.f32 %v877_v25, %v305_v26 }
 0x2be   :  { %v879_v46 = vpop.f32.mrf.mxu1 }
 0x2bf   :  { %v880_v47 = vadd.f32 %v879_v46, %v878_v45 }
 0x2c0   :  { %v405_v28 = vpop.f32.mrf.mxu0 }
 0x2c1   :  { %v406_v29 = vadd.f32 %v405_v28, %v365_v27  ;;  %v368_v51 = vadd.f32 %v880_v47, %v310_v48  ;;  %v983_v47 = vld [vmem:[%s1470_s8 + $0x4] ss:$12 sps:$4 sm:$0xff]  }
 0x2c2   :  { %v930_v30 = vpop.f32.mrf.mxu0  ;;  %736 = vmatprep.mubr.bf16.mxu1 %v983_v47  ;;  %v674_v48 = vld [vmem:[%s1471_s9] sm:$0xff] }
 0x2c3   :  { %v412_v32 = vmul.f32 0.2, %v406_v29 }
 0x2c4   :  { %v408_v33 = vpop.f32.mrf.mxu0 }
 0x2c5   :  { %985 = vtanh.f32 %v412_v32  ;;  %v409_v53 = vadd.f32 %v408_v33, %v368_v51 }
 0x2c6   :  { %v931_v35 = vpop.f32.mrf.mxu0 }
 0x2d2   :  { %v986_v36 = vpop.eup %985 }
 0x2d3   :  { %v1268_v38 = vmul.f32 2.0, %v986_v36 }
 0x2d5   :  { %v415_v43 = vmul.f32 1.442695, %v1268_v38 }
 0x2d7   :  { %987 = vpow2.f32 %v415_v43 }
 0x2e4   :  { %v988_v52 = vpop.eup %987 }
 0x2e5   :  { %v417_v54 = vmul.f32 %v988_v52, %v39_v50 }
 0x2e7   :  { %v418_v55 = vadd.f32 %v417_v54, %v409_v53 }
 0x2e9   :  { %440 = vrot.lane.b32.xlu1 %v418_v55, %s999_s2  ;;  %446 = vrot.lane.b32.xlu0 %v418_v55, %s1003_s22  ;;  %800 = vst [vmem:[%s1467_s10 + $0x8] sm:$0xff] %v418_v55 }
 0x2ed   :  { %437 = vrot.lane.b32.xlu1 %v418_v55, %s1001_s17  ;;  %443 = vrot.lane.b32.xlu0 %v418_v55, %s998_s15 }
 0x2f1   :  { %434 = vrot.lane.b32.xlu1 %v418_v55, %s994_s19  ;;  %431 = vrot.lane.b32.xlu0 %v418_v55, %s1000_s16 }
 0x2f5   :  { %428 = vrot.lane.b32.xlu1 %v418_v55, %s995_s20  ;;  %425 = vrot.lane.b32.xlu0 %v418_v55, %s997_s25 }
 0x2f9   :  { %479 = vperm.xlu1 %971, %v461_v57   ;;  %474 = vperm.xlu0 %972, %v460_v58  }
 0x2fd   :  { %469 = vperm.xlu1 %971, %v459_v59   ;;  %464 = vperm.xlu0 %972, %v458_v60  }
 0x35b   :  { %v441_v61 = vpop.permute.xlu1 %440  ;;  %v447_v62 = vpop.permute.xlu0 %446 }
 0x35c   :  { %v448_v63 = vmul.f32 %v447_v62, %v1251_v16  ;;  %v442_v1 = vmul.f32 %v441_v61, %v1215_v13 }
 0x35e   :  { %v453_v0 = vpack.c.bf16 %v448_v63, %v448_v63 }
 0x35f   :  { %v438_v2 = vpop.permute.xlu1 %437  ;;  %v444_v3 = vpop.permute.xlu0 %443 }
 0x360   :  { %v501_v4 = vsel %vm499_vm3, %v453_v0, 0  ;;  %v439_v5 = vmul.f32 %v438_v2, %v1230_v34  ;;  %v445_v6 = vmul.f32 %v444_v3, %v1204_v49  ;;  %954 = vmatprep.subr.msk.bf16.mxu0 %vm499_vm3, %v453_v0 }
 0x361   :  { %933 = vmatpush3.bf16.msra.mxu0 %v501_v4 }
 0x362   :  { %v452_v7 = vpack.c.bf16 %v445_v6, %v442_v1  ;;  %v451_v15 = vpack.c.bf16 %v439_v5, %v418_v55 }
 0x363   :  { %v435_v9 = vpop.permute.xlu1 %434  ;;  %v432_v11 = vpop.permute.xlu0 %431 }
 0x364   :  { %v436_v8 = vmul.f32 %v435_v9, %v1098_v12  ;;  %v433_v17 = vmul.f32 %v432_v11, %v1219_v20  ;;  %934 = vmatprep.subr.bf16.mxu0 %v452_v7 }
 0x365   :  { %935 = vmatpush3.bf16.msra.mxu0 %v452_v7 }
 0x366   :  { %936 = vmatprep.subr.bf16.mxu0 %v451_v15  ;;  %v450_v41 = vpack.c.bf16 %v436_v8, %v433_v17 }
 0x367   :  { %v429_v31 = vpop.permute.xlu1 %428  ;;  %v426_v37 = vpop.permute.xlu0 %425 }
 0x368   :  { %v430_v19 = vmul.f32 %v429_v31, %v1102_v14  ;;  %v427_v21 = vmul.f32 %v426_v37, %v1106_v18 }
 0x369   :  { %937 = vmatpush3.bf16.msra.mxu0 %v451_v15 }
 0x36a   :  { %938 = vmatprep.subr.bf16.mxu0 %v450_v41  ;;  %v449_v10 = vpack.c.bf16 %v430_v19, %v427_v21 }
 0x36d   :  { %939 = vmatpush3.bf16.msra.mxu0 %v450_v41 }
 0x36e   :  { %940 = vmatprep.subr.bf16.mxu0 %v449_v10 }
 0x371   :  { %941 = vmatpush3.bf16.msra.mxu0 %v449_v10 }
 0x372   :  { %946 = vmatprep.subr.bf16.mxu0 %v1002_v44 }
 0x374   :  { %943 = vmatmul.mubr.msk.bf16.vlgmr.msra.gmra.mxu0 %vm492_vm2, %v980_v22  ;;  %v475_v39 = vpop.permute.xlu0 %474  ;;  %v480_v40 = vpop.permute.xlu1 %479 }
 0x375   :  { %950 = vmatprep.mubr.msk.bf16.mxu0 %vm1004_vm1, %v1002_v44 }
 0x378   :  { %v465_v26 = vpop.permute.xlu0 %464  ;;  %v470_v30 = vpop.permute.xlu1 %469 }
 0x434   :  { %v944_v42 = vpop.f32.mrf.mxu0 }
 0x435   :  { %v546_v23 = vadd.f32 %v944_v42, %v475_v39 }
 0x436   :  { %v537_v24 = vpop.f32.mrf.mxu0 }
 0x437   :  { %v1316_v25 = vmax.f32 %v546_v23, 0.0  ;;  %v538_v28 = vadd.f32 %v537_v24, %v465_v26 }
 0x438   :  { %v945_v27 = vpop.f32.mrf.mxu0 }
 0x439   :  { %v549_v29 = vadd.f32 %v945_v27, %v480_v40  ;;  %632 = vrot.lane.b32.xlu0 %v1316_v25, %s998_s15  ;;  %v1322_v36 = vmax.f32 %v538_v28, 0.0 }
 0x43a   :  { %v540_v32 = vpop.f32.mrf.mxu0 }
 0x43b   :  { %v1320_v33 = vmax.f32 %v549_v29, 0.0  ;;  %v541_v35 = vadd.f32 %v540_v32, %v470_v30 }
 0x43d   :  { %v1324_v43 = vmax.f32 %v541_v35, 0.0  ;;  %634 = vrot.lane.b32.xlu1 %v1320_v33, %s998_s15  ;;  %596 = vrot.lane.b32.xlu0 %v1316_v25, %s994_s19  ;;  %v661_v45 = vpack.c.bf16 %v1320_v33, %v1316_v25 }
 0x43f   :  { %v660_v46 = vpack.c.bf16 %v1324_v43, %v1322_v36 }
 0x441   :  { %598 = vrot.lane.b32.xlu1 %v1320_v33, %s994_s19  ;;  %620 = vrot.lane.b32.xlu0 %v1316_v25, %s999_s2 }
 0x445   :  { %622 = vrot.lane.b32.xlu1 %v1320_v33, %s999_s2  ;;  %584 = vrot.lane.b32.xlu0 %v1316_v25, %s1000_s16 }
 0x449   :  { %586 = vrot.lane.b32.xlu1 %v1320_v33, %s1000_s16  ;;  %608 = vrot.lane.b32.xlu0 %v1316_v25, %s1001_s17 }
 0x44d   :  { %610 = vrot.lane.b32.xlu1 %v1320_v33, %s1001_s17  ;;  %572 = vrot.lane.b32.xlu0 %v1316_v25, %s995_s20 }
 0x451   :  { %574 = vrot.lane.b32.xlu1 %v1320_v33, %s995_s20  ;;  %628 = vrot.lane.b32.xlu0 %v1322_v36, %s998_s15 }
 0x455   :  { %630 = vrot.lane.b32.xlu1 %v1324_v43, %s998_s15  ;;  %592 = vrot.lane.b32.xlu0 %v1322_v36, %s994_s19 }
 0x459   :  { %594 = vrot.lane.b32.xlu1 %v1324_v43, %s994_s19  ;;  %616 = vrot.lane.b32.xlu0 %v1322_v36, %s999_s2 }
 0x45d   :  { %618 = vrot.lane.b32.xlu1 %v1324_v43, %s999_s2  ;;  %580 = vrot.lane.b32.xlu0 %v1322_v36, %s1000_s16 }
 0x461   :  { %582 = vrot.lane.b32.xlu1 %v1324_v43, %s1000_s16  ;;  %604 = vrot.lane.b32.xlu0 %v1322_v36, %s1001_s17 }
 0x465   :  { %606 = vrot.lane.b32.xlu1 %v1324_v43, %s1001_s17  ;;  %568 = vrot.lane.b32.xlu0 %v1322_v36, %s995_s20 }
 0x469   :  { %570 = vrot.lane.b32.xlu1 %v1324_v43, %s995_s20  ;;  %560 = vrot.lane.b32.xlu0 %v1316_v25, %s997_s25 }
 0x46d   :  { %562 = vrot.lane.b32.xlu1 %v1320_v33, %s997_s25  ;;  %556 = vrot.lane.b32.xlu0 %v1322_v36, %s997_s25 }
 0x471   :  { %558 = vrot.lane.b32.xlu1 %v1324_v43, %s997_s25  ;;  %644 = vrot.lane.b32.xlu0 %v1316_v25, %s1003_s22 }
 0x475   :  { %646 = vrot.lane.b32.xlu1 %v1320_v33, %s1003_s22  ;;  %640 = vrot.lane.b32.xlu0 %v1322_v36, %s1003_s22 }
 0x479   :  { %642 = vrot.lane.b32.xlu1 %v1324_v43, %s1003_s22  ;;  %678 = vperm.xlu0 %972, %v674_v48  }
 0x4ab   :  { %v633_v50 = vpop.permute.xlu0 %632 }
 0x4ac   :  { %v638_v53 = vmul.f32 %v633_v50, %v1204_v49 }
 0x4af   :  { %v635_v51 = vpop.permute.xlu1 %634  ;;  %v597_v52 = vpop.permute.xlu0 %596 }
 0x4b0   :  { %v639_v54 = vmul.f32 %v635_v51, %v1204_v49  ;;  %v602_v58 = vmul.f32 %v597_v52, %v1098_v12 }
 0x4b2   :  { %v667_v55 = vpack.c.bf16 %v639_v54, %v638_v53 }
 0x4b3   :  { %v599_v56 = vpop.permute.xlu1 %598  ;;  %v621_v57 = vpop.permute.xlu0 %620 }
 0x4b4   :  { %v603_v59 = vmul.f32 %v599_v56, %v1098_v12  ;;  %891 = vmatprep.subr.bf16.mxu1 %v667_v55  ;;  %v626_v41 = vmul.f32 %v621_v57, %v1215_v13 }
 0x4b6   :  { %v659_v60 = vpack.c.bf16 %v603_v59, %v602_v58 }
 0x4b7   :  { %v623_v61 = vpop.permute.xlu1 %622  ;;  %v585_v62 = vpop.permute.xlu0 %584 }
 0x4b8   :  { %892 = vmatpush3.bf16.msra.mxu1 %v659_v60  ;;  %v627_v15 = vmul.f32 %v623_v61, %v1215_v13 }
 0x4ba   :  { %v665_v10 = vpack.c.bf16 %v627_v15, %v626_v41 }
 0x4bb   :  { %v587_v63 = vpop.permute.xlu1 %586  ;;  %v609_v0 = vpop.permute.xlu0 %608 }
 0x4bc   :  { %v591_v19 = vmul.f32 %v587_v63, %v1219_v20  ;;  %v614_v30 = vmul.f32 %v609_v0, %v1230_v34 }
 0x4bf   :  { %v611_v2 = vpop.permute.xlu1 %610  ;;  %v573_v3 = vpop.permute.xlu0 %572 }
 0x4c0   :  { %v578_v50 = vmul.f32 %v573_v3, %v1102_v14 }
 0x4c3   :  { %v575_v1 = vpop.permute.xlu1 %574  ;;  %v629_v4 = vpop.permute.xlu0 %628 }
 0x4c4   :  { %v636_v7 = vmul.f32 %v629_v4, %v1204_v49  ;;  %v579_v32 = vmul.f32 %v575_v1, %v1102_v14  ;;  %v981_v4 = vld [vmem:[%s1470_s8] ss:$12 sps:$4 sm:$0xff]  }
 0x4c6   :  { %v655_v53 = vpack.c.bf16 %v579_v32, %v578_v50 }
 0x4c7   :  { %v631_v5 = vpop.permute.xlu1 %630  ;;  %v593_v6 = vpop.permute.xlu0 %592 }
 0x4c8   :  { %v637_v9 = vmul.f32 %v631_v5, %v1204_v49  ;;  %v600_v31 = vmul.f32 %v593_v6, %v1098_v12  ;;  %v590_v49 = vmul.f32 %v585_v62, %v1219_v20 }
 0x4ca   :  { %v666_v11 = vpack.c.bf16 %v637_v9, %v636_v7  ;;  %v657_v23 = vpack.c.bf16 %v591_v19, %v590_v49  ;;  %v419_v19 = vrot.slane %v1268_v38, 4 }
 0x4cb   :  { %v595_v8 = vpop.permute.xlu1 %594  ;;  %v617_v17 = vpop.permute.xlu0 %616 }
 0x4cc   :  { %v601_v37 = vmul.f32 %v595_v8, %v1098_v12  ;;  %893 = vmatprep.subr.bf16.mxu1 %v666_v11  ;;  %v624_v40 = vmul.f32 %v617_v17, %v1215_v13  ;;  %v615_v12 = vmul.f32 %v611_v2, %v1230_v34 }
 0x4ce   :  { %v658_v21 = vpack.c.bf16 %v601_v37, %v600_v31 }
 0x4cf   :  { %v619_v22 = vpop.permute.xlu1 %618  ;;  %v581_v39 = vpop.permute.xlu0 %580 }
 0x4d0   :  { %v625_v42 = vmul.f32 %v619_v22, %v1215_v13  ;;  %894 = vmatpush3.bf16.msra.mxu1 %v658_v21  ;;  %v588_v28 = vmul.f32 %v581_v39, %v1219_v20  ;;  %v663_v13 = vpack.c.bf16 %v615_v12, %v614_v30  ;;  %v420_v21 = vadd.f32 %v419_v19, %v1268_v38  ;;  %v675_v38 = vld [vmem:[%s1471_s9 + $0x8] sm:$0xff] }
 0x4d1   :  { %895 = vmatprep.subr.bf16.mxu1 %v665_v10 }
 0x4d2   :  { %v664_v24 = vpack.c.bf16 %v625_v42, %v624_v40  ;;  %v421_v39 = vrot.slane %v420_v21, 2 }
 0x4d3   :  { %v583_v26 = vpop.permute.xlu1 %582  ;;  %v605_v27 = vpop.permute.xlu0 %604 }
 0x4d4   :  { %v589_v29 = vmul.f32 %v583_v26, %v1219_v20  ;;  %896 = vmatpush3.bf16.msra.mxu1 %v657_v23  ;;  %v612_v51 = vmul.f32 %v605_v27, %v1230_v34  ;;  %v422_v42 = vadd.f32 %v421_v39, %v420_v21 }
 0x4d5   :  { %897 = vmatprep.subr.bf16.mxu1 %v664_v24 }
 0x4d6   :  { %v656_v35 = vpack.c.bf16 %v589_v29, %v588_v28  ;;  %v423_v24 = vrot.slane %v422_v42, 1 }
 0x4d7   :  { %v607_v47 = vpop.permute.xlu1 %606  ;;  %v569_v48 = vpop.permute.xlu0 %568 }
 0x4d8   :  { %v613_v52 = vmul.f32 %v607_v47, %v1230_v34  ;;  %898 = vmatpush3.bf16.msra.mxu1 %v656_v35  ;;  %v576_v56 = vmul.f32 %v569_v48, %v1102_v14  ;;  %v424_v27 = vadd.f32 %v423_v24, %v422_v42 }
 0x4d9   :  { %899 = vmatprep.subr.bf16.mxu1 %v663_v13 }
 0x4da   :  { %v662_v20 = vpack.c.bf16 %v613_v52, %v612_v51 }
 0x4db   :  { %v571_v54 = vpop.permute.xlu1 %570  ;;  %v561_v55 = vpop.permute.xlu0 %560 }
 0x4dc   :  { %v577_v57 = vmul.f32 %v571_v54, %v1102_v14  ;;  %900 = vmatpush3.bf16.msra.mxu1 %v655_v53  ;;  %v566_v61 = vmul.f32 %v561_v55, %v1106_v18 }
 0x4dd   :  { %901 = vmatprep.subr.bf16.mxu1 %v662_v20 }
 0x4de   :  { %v654_v58 = vpack.c.bf16 %v577_v57, %v576_v56 }
 0x4df   :  { %v563_v59 = vpop.permute.xlu1 %562  ;;  %v557_v60 = vpop.permute.xlu0 %556 }
 0x4e0   :  { %v567_v62 = vmul.f32 %v563_v59, %v1106_v18  ;;  %902 = vmatpush3.bf16.msra.mxu1 %v654_v58  ;;  %v564_v2 = vmul.f32 %v557_v60, %v1106_v18  ;;  %v993_v60 = vld [vmem:[%s1461_s0] sm:$0xff] }
 0x4e1   :  { %903 = vmatprep.subr.bf16.mxu1 %v661_v45 }
 0x4e2   :  { %v653_v34 = vpack.c.bf16 %v567_v62, %v566_v61 }
 0x4e3   :  { %v559_v63 = vpop.permute.xlu1 %558  ;;  %v645_v0 = vpop.permute.xlu0 %644 }
 0x4e4   :  { %v565_v14 = vmul.f32 %v559_v63, %v1106_v18  ;;  %904 = vmatpush3.bf16.msra.mxu1 %v653_v34  ;;  %v650_v25 = vmul.f32 %v645_v0, %v1251_v16 }
 0x4e5   :  { %905 = vmatprep.subr.bf16.mxu1 %v660_v46  ;;  %v984_v46 = vld [vmem:[%s1470_s8 + $0x8] ss:$12 sps:$4 sm:$0xff]   ;;  %s1005_s8 = smov 64  }
 0x4e6   :  { %v652_v3 = vpack.c.bf16 %v565_v14, %v564_v2 }
 0x4e7   :  { %v647_v1 = vpop.permute.xlu1 %646  ;;  %v641_v45 = vpop.permute.xlu0 %640 }
 0x4e8   :  { %v651_v33 = vmul.f32 %v647_v1, %v1251_v16  ;;  %906 = vmatpush3.bf16.msra.mxu1 %v652_v3  ;;  %v648_v18 = vmul.f32 %v641_v45, %v1251_v16 }
 0x4ea   :  { %v669_v5 = vpack.c.bf16 %v651_v33, %v650_v25 }
 0x4eb   :  { %v643_v6 = vpop.permute.xlu1 %642  ;;  %737 = vmatmul.mubr.bf16.vlgmr.msra.gmra.mxu1 %v981_v4 }
 0x4ec   :  { %v649_v36 = vmul.f32 %v643_v6, %v1251_v16  ;;  %947 = vmatpush3.bf16.msra.mxu0 %v669_v5 }
 0x4ed   :  { %948 = vmatprep.subr.bf16.mxu0 %v1002_v44 }
 0x4ee   :  { %v668_v43 = vpack.c.bf16 %v649_v36, %v648_v18 }
 0x4f0   :  { %949 = vmatpush3.bf16.msra.mxu0 %v668_v43 }
 0x4f3   :  { %951 = vmatmul.mubr.msk.bf16.vlgmr.msra.gmra.mxu0 %vm102_vm0, %v984_v46 }
 0x4f4   :  { %v679_v15 = vpop.permute.xlu0 %678 }
 0x5ab   :  { %v907_v7 = vpop.f32.mrf.mxu1 }
 0x5ad   :  { %v908_v9 = vpop.f32.mrf.mxu1 }
 0x5ae   :  { %v909_v11 = vadd.f32 %v908_v9, %v907_v7 }
 0x5af   :  { %v910_v47 = vpop.f32.mrf.mxu1 }
 0x5b0   :  { %v739_v8 = vadd.f32 %v909_v11, %v679_v15 }
 0x5b1   :  { %v911_v52 = vpop.f32.mrf.mxu1 }
 0x5b2   :  { %v912_v20 = vadd.f32 %v911_v52, %v910_v47 }
 0x5b3   :  { %v779_v17 = vpop.f32.mrf.mxu0 }
 0x5b4   :  { %v780_v31 = vadd.f32 %v779_v17, %v739_v8 }
 0x5b5   :  { %v952_v37 = vpop.f32.mrf.mxu0 }
 0x5b6   :  { %v786_v16 = vmul.f32 0.2, %v780_v31 }
 0x5b7   :  { %v782_v41 = vpop.f32.mrf.mxu0 }
 0x5b8   :  { %989 = vtanh.f32 %v786_v16 }
 0x5b9   :  { %v953_v44 = vpop.f32.mrf.mxu0 }
 0x5c5   :  { %v990_v10 = vpop.eup %989 }
 0x5c6   :  { %v788_v22 = vmul.f32 2.0, %v990_v10 }
 0x5c8   :  { %v793_v49 = vrot.slane %v788_v22, 4  ;;  %v789_v13 = vmul.f32 1.442695, %v788_v22 }
 0x5ca   :  { %v794_v40 = vadd.f32 %v793_v49, %v788_v22  ;;  %991 = vpow2.f32 %v789_v13 }
 0x5cc   :  { %v795_v23 = vrot.slane %v794_v40, 2 }
 0x5ce   :  { %v796_v12 = vadd.f32 %v795_v23, %v794_v40 }
 0x5d0   :  { %v797_v26 = vrot.slane %v796_v12, 1 }
 0x5d2   :  { %v798_v28 = vadd.f32 %v797_v26, %v796_v12 }
 0x5d4   :  { %v801_v29 = vadd.f32 %v798_v28, %v424_v27 }
 0x5d6   :  { %816 = vrot.lane.b32.xlu1 %v801_v29, %s1005_s8  ;;  %v803_v30 = vsel %vm802_vm4, %v801_v29, 0.0 }
 0x5d7   :  { %804 = vadd.xlane.f32.xlu0 %v803_v30  ;;  %v992_v55 = vpop.eup %991 }
 0x5d8   :  { %v791_v61 = vmul.f32 %v993_v60, %v992_v55 }
 0x5ed   :  { %683 = vperm.xlu0 %972, %v675_v38  }
 0x648   :  { %v817_v32 = vpop.permute.xlu1 %816 }
 0x649   :  { %v819_v35 = vsel %vm802_vm4, %v817_v32, 0.0 }
 0x64a   :  { %820 = vadd.xlane.f32.xlu1 %v819_v35 }
 0x660   :  { %v805_v48 = vpop.xlane.xlu0 %804 }
 0x661   :  { %v806_v50 = vrot.slane %v805_v48, 4 }
 0x663   :  { %v807_v51 = vadd.f32 %v806_v50, %v805_v48 }
 0x665   :  { %v808_v53 = vrot.slane %v807_v51, 2 }
 0x667   :  { %v809_v54 = vadd.f32 %v808_v53, %v807_v51 }
 0x668   :  { %v684_v56 = vpop.permute.xlu0 %683 }
 0x669   :  { %v742_v57 = vadd.f32 %v912_v20, %v684_v56  ;;  %v810_v58 = vrot.slane %v809_v54, 1 }
 0x66b   :  { %v783_v59 = vadd.f32 %v782_v41, %v742_v57  ;;  %v811_v62 = vadd.f32 %v810_v58, %v809_v54 }
 0x66d   :  { %v792_v34 = vadd.f32 %v791_v61, %v783_v59  ;;  %955 = vpush %v811_v62 }
 0x66f   :  { %799 = vst [vmem:[%s1467_s10] sm:$0xff] %v792_v34 }
 0x69e   :  { %s956_s14 = spop %955 }
 0x69f   :  { %v813_v63 = vstv %s956_s14 }
 0x6a0   :  { %814 = vst [vmem:[%s1472_s11] sm:$0x1] %v813_v63 }
 0x6d3   :  { %v821_v0 = vpop.xlane.xlu1 %820 }
 0x6d4   :  { %v822_v2 = vrot.slane %v821_v0, 4 }
 0x6d6   :  { %v823_v14 = vadd.f32 %v822_v2, %v821_v0 }
 0x6d8   :  { %v824_v3 = vrot.slane %v823_v14, 2 }
 0x6da   :  { %v825_v1 = vadd.f32 %v824_v3, %v823_v14 }
 0x6dc   :  { %v826_v4 = vrot.slane %v825_v1, 1 }
 0x6de   :  { %v827_v25 = vadd.f32 %v826_v4, %v825_v1 }
 0x6e0   :  { %957 = vpush %v827_v25 }
 0x711   :  { %s958_s0 = spop %957 }
 0x712   :  { %v829_v33 = vstv %s958_s0 }
 0x713   :  { %830 = vst [vmem:[%s1472_s11 + $0x1] sm:$0x1] %v829_v33 }

</bundles_post_ra>
